<compile_context>
chip_gen: v5e
topology: v5e:2x2
jax: 0.10.0
libtpu: 0.0.40
codegen_flags: <defaults>
</compile_context>

<pallas_src>
import jax
import jax.numpy as jnp
import numpy as np
from jax.experimental import pallas as pl
from jax.experimental.pallas import tpu as pltpu

EPSILON = 0.001


# --------------------------------------------------------------------------- #
# DFT / irfft matrix construction (numpy, cached -> trace-safe constants).
# --------------------------------------------------------------------------- #
_DFT_CACHE = {}


def _dft_matrices(n):
    """Full symmetric DFT matrix F[j,k] = exp(-2*pi*i*j*k/n) as (cos, sin) f32."""
    key = ("full", int(n))
    if key not in _DFT_CACHE:
        k = np.arange(n, dtype=np.int64)
        jk = np.mod(np.outer(k, k), n).astype(np.float64)   # exact phase mod n
        ang = (-2.0 * np.pi / n) * jk
        _DFT_CACHE[key] = (np.cos(ang).astype(np.float32),
                           np.sin(ang).astype(np.float32))
    return _DFT_CACHE[key]


def _rdft_half_matrices(n):
    """First n//2+1 columns of F_n (real-input rFFT right-multiply)."""
    key = ("half", int(n))
    if key not in _DFT_CACHE:
        nh = n // 2 + 1
        fr, fi = _dft_matrices(n)
        _DFT_CACHE[key] = (np.ascontiguousarray(fr[:, :nh]),
                           np.ascontiguousarray(fi[:, :nh]))
    return _DFT_CACHE[key]


def _irfft_matrices(n):
    """Real inverse-DFT (irfft) matrices [n//2+1, n] with Hermitian weights.

    R[:, m] = sum_k Re(Q[:, k]) * icr[k, m] + Im(Q[:, k]) * ici[k, m]
    reconstructs the full inverse column transform of a Hermitian half-spectrum.
    (The 1/n scale is folded into the Wiener stage.)
    """
    key = ("irfft", int(n))
    if key not in _DFT_CACHE:
        nh = n // 2 + 1
        k = np.arange(nh, dtype=np.int64)
        m = np.arange(n, dtype=np.int64)
        km = np.mod(np.outer(k, m), n).astype(np.float64)
        ang = (2.0 * np.pi / n) * km
        w = np.full((nh, 1), 2.0, np.float64)
        w[0, 0] = 1.0
        if n % 2 == 0:
            w[nh - 1, 0] = 1.0                       # Nyquist column: weight 1
        _DFT_CACHE[key] = ((w * np.cos(ang)).astype(np.float32),
                           (-w * np.sin(ang)).astype(np.float32))
    return _DFT_CACHE[key]


# --------------------------------------------------------------------------- #
# VMEM budgeting.
# --------------------------------------------------------------------------- #
def _vmem_budget_bytes():
    """Generation-aware per-TensorCore VMEM cap (0.85 x physical capacity)."""
    try:
        cap = int(pltpu.get_tpu_info().vmem_capacity_bytes)
    except Exception:
        cap = 64 * 2 ** 20        # conservative fallback (v7x per-core VMEM)
    return int(0.85 * cap)


def _fused_vmem_estimate(M, N, Nh):
    """Rough peak-VMEM estimate (bytes) of the fused single-call kernel."""
    elems = (4 * M * M           # frm/fim + in-kernel sum/diff copies
             + 4 * N * Nh        # frh/fih + icr/ici
             + 5 * M * N         # stacked input, inverse-right partials, output
             + 30 * M * Nh)      # frequency-domain temporaries (generous)
    return int(1.5 * 4 * elems)


# --------------------------------------------------------------------------- #
# Fused single-call kernel (whole working set resident in VMEM).
# --------------------------------------------------------------------------- #
def _make_fused_kernel(M, N, Nh, inverse_dtype):
    f32 = jnp.float32
    karatsuba_inverse = np.dtype(inverse_dtype) == np.dtype(np.float32)
    scale = 1.0 / (M * N)                 # ifft2 1/(M*N), folded into Wiener

    def kernel(xs_ref, frm_ref, fim_ref, frh_ref, fih_ref, icr_ref, ici_ref,
               out_ref):
        def mm(a, b, cd=f32):
            return jnp.dot(a.astype(cd), b.astype(cd),
                           preferred_element_type=f32)

        frm = frm_ref[...]                                # [M, M]
        fim = fim_ref[...]

        # ---- forward rFFT over columns (real input, both images fused) ----
        xs = xs_ref[...]                                  # [2M, N] (lr rows on top)
        cr = mm(xs, frh_ref[...])                         # [2M, Nh]
        ci = mm(xs, fih_ref[...])                         # [2M, Nh]

        # ---- forward full FFT over rows (complex), per image, Karatsuba ----
        frm_p = frm + fim
        spectra = []
        for rows in (slice(0, M), slice(M, 2 * M)):       # lr then hr (row slices)
            a = cr[rows]
            b = ci[rows]
            t1 = mm(frm, a)
            t2 = mm(fim, b)
            t3 = mm(frm_p, a + b)
            spectra.append((t1 - t2, t3 - t1 - t2))       # (Re, Im), [M, Nh]
        (l_re, l_im), (h_re, h_im) = spectra

        # ---- Wiener division (f32; EUP approx reciprocal + 1 Newton step) ----
        den = h_re * h_re + h_im * h_im + EPSILON
        r0 = pl.reciprocal(den, approx=True)
        inv = r0 * (2.0 - den * r0) * scale
        q_re = (h_re * l_re + h_im * l_im) * inv          # Re(conj(H) * L) / den
        q_im = (h_re * l_im - h_im * l_re) * inv          # Im(conj(H) * L) / den

        # ---- inverse row transform: conj(F_M) @ Q ----
        cd = inverse_dtype
        if karatsuba_inverse:
            u1 = mm(frm, q_re)
            u2 = mm(fim, q_im)
            u3 = mm(frm - fim, q_re + q_im)
            p_re = u1 + u2
            p_im = u3 - u1 + u2
        else:
            # low-precision MXU path: plain 4-mult product (no cancellation)
            frm_c = frm.astype(cd)
            fim_c = fim.astype(cd)
            qr_c = q_re.astype(cd)
            qi_c = q_im.astype(cd)
            p_re = (jnp.dot(frm_c, qr_c, preferred_element_type=f32)
                    + jnp.dot(fim_c, qi_c, preferred_element_type=f32))
            p_im = (jnp.dot(frm_c, qi_c, preferred_element_type=f32)
                    - jnp.dot(fim_c, qr_c, preferred_element_type=f32))

        # ---- inverse column transform: real irfft (Hermitian symmetry) ----
        r = mm(p_re, icr_ref[...], cd) + mm(p_im, ici_ref[...], cd)
        out_ref[...] = jnp.abs(r)

    return kernel


# --------------------------------------------------------------------------- #
# Tiled path: canonical tiled matmuls + row-tiled Wiener (large images / v7x).
# --------------------------------------------------------------------------- #
def _pick_tile(dim, target, align):
    """Largest aligned divisor of `dim` <= target, else the full extent."""
    if dim <= target:
        return dim
    t = (target // align) * align
    while t >= align:
        if dim % t == 0:
            return t
        t -= align
    return dim   # TODO(synk): pad to an aligned size instead of full-extent block


def _tiled_matmul(a, b, *, compute_dtype, vmem_limit, absolute=False,
                  tm=256, tk=512, tn=256):
    M, K = a.shape
    K2, N = b.shape
    assert K == K2
    tm = _pick_tile(M, tm, 8)
    tk = _pick_tile(K, tk, 128)
    tn = _pick_tile(N, tn, 128)
    grid = (M // tm, N // tn, K // tk)

    def kernel(a_ref, b_ref, o_ref, acc_ref):
        @pl.when(pl.program_id(2) == 0)
        def _init():
            acc_ref[...] = jnp.zeros_like(acc_ref)

        acc_ref[...] += jnp.dot(a_ref[...], b_ref[...],
                                preferred_element_type=jnp.float32)

        @pl.when(pl.program_id(2) == pl.num_programs(2) - 1)
        def _done():
            r = acc_ref[...]
            if absolute:
                r = jnp.abs(r)
            o_ref[...] = r.astype(o_ref.dtype)

    return pl.pallas_call(
        kernel,
        out_shape=jax.ShapeDtypeStruct((M, N), jnp.float32),
        grid_spec=pltpu.PrefetchScalarGridSpec(
            num_scalar_prefetch=0,
            grid=grid,
            in_specs=[pl.BlockSpec((tm, tk), lambda i, j, k: (i, k)),
                      pl.BlockSpec((tk, tn), lambda i, j, k: (k, j))],
            out_specs=pl.BlockSpec((tm, tn), lambda i, j, k: (i, j)),
            scratch_shapes=[pltpu.VMEM((tm, tn), jnp.float32)]),
        compiler_params=pltpu.CompilerParams(
            dimension_semantics=("parallel", "parallel", "arbitrary"),
            vmem_limit_bytes=vmem_limit),
        cost_estimate=pl.CostEstimate(
            flops=int(2 * M * N * K), transcendentals=0,
            bytes_accessed=int(4 * (M * K + K * N + M * N))),
    )(a.astype(compute_dtype), b.astype(compute_dtype))


def _wiener_divide(l_re, l_im, h_re, h_im, *, scale, vmem_limit):
    M, Nh = l_re.shape
    tb = _pick_tile(M, 256, 8)
    grid = (M // tb,)

    def kernel(lre_ref, lim_ref, hre_ref, him_ref, qre_ref, qim_ref):
        hre = hre_ref[...]
        him = him_ref[...]
        lre = lre_ref[...]
        lim = lim_ref[...]
        den = hre * hre + him * him + EPSILON
        r0 = pl.reciprocal(den, approx=True)
        inv = r0 * (2.0 - den * r0) * scale       # Newton step + folded 1/(M*N)
        qre_ref[...] = (hre * lre + him * lim) * inv
        qim_ref[...] = (hre * lim - him * lre) * inv

    spec = pl.BlockSpec((tb, Nh), lambda i: (i, 0))
    return pl.pallas_call(
        kernel,
        out_shape=(jax.ShapeDtypeStruct((M, Nh), jnp.float32),
                   jax.ShapeDtypeStruct((M, Nh), jnp.float32)),
        grid_spec=pltpu.PrefetchScalarGridSpec(
            num_scalar_prefetch=0,
            grid=grid,
            in_specs=[spec, spec, spec, spec],
            out_specs=[spec, spec]),
        compiler_params=pltpu.CompilerParams(
            dimension_semantics=("parallel",),
            vmem_limit_bytes=vmem_limit),
    )(l_re, l_im, h_re, h_im)


def _kernel_estimate_tiled(lr, hr, frm, fim, frh, fih, icr, ici,
                           inverse_dtype, vmem_limit):
    M, N = lr.shape
    Nh = N // 2 + 1
    f32 = jnp.float32

    # ---- forward rFFT over columns (both images row-stacked) ----
    xs = jnp.concatenate([lr, hr], axis=0)                           # [2M, N]
    fwd_right = jnp.concatenate([jnp.asarray(frh), jnp.asarray(fih)], axis=1)
    c = _tiled_matmul(xs, fwd_right, compute_dtype=f32,
                      vmem_limit=vmem_limit)                         # [2M, 2Nh]
    cr, ci = c[:, :Nh], c[:, Nh:]

    # per-image column stacking so both images share the row transform
    dr = jnp.concatenate([cr[:M], cr[M:]], axis=1)                   # [M, 2Nh]
    di = jnp.concatenate([ci[:M], ci[M:]], axis=1)

    # ---- forward full FFT over rows: block-matrix complex product ----
    fwd_left = jnp.concatenate(
        [jnp.concatenate([jnp.asarray(frm), -jnp.asarray(fim)], axis=1),
         jnp.concatenate([jnp.asarray(fim), jnp.asarray(frm)], axis=1)], axis=0)
    s = _tiled_matmul(fwd_left, jnp.concatenate([dr, di], axis=0),
                      compute_dtype=f32, vmem_limit=vmem_limit)      # [2M, 2Nh]
    l_re, h_re = s[:M, :Nh], s[:M, Nh:]
    l_im, h_im = s[M:, :Nh], s[M:, Nh:]

    # ---- Wiener division ----
    q_re, q_im = _wiener_divide(l_re, l_im, h_re, h_im,
                                scale=1.0 / (M * N), vmem_limit=vmem_limit)

    # ---- inverse row transform: conj(F_M) @ Q (block-matrix product) ----
    inv_left = jnp.concatenate(
        [jnp.concatenate([jnp.asarray(frm), jnp.asarray(fim)], axis=1),
         jnp.concatenate([-jnp.asarray(fim), jnp.asarray(frm)], axis=1)], axis=0)
    t = _tiled_matmul(inv_left, jnp.concatenate([q_re, q_im], axis=0),
                      compute_dtype=inverse_dtype,
                      vmem_limit=vmem_limit)                         # [2M, Nh]

    # ---- inverse column transform: real irfft (+abs fused in the epilogue) ----
    qcat = jnp.concatenate([t[:M], t[M:]], axis=1)                   # [M, 2Nh]
    icol = jnp.concatenate([jnp.asarray(icr), jnp.asarray(ici)], axis=0)
    return _tiled_matmul(qcat, icol, compute_dtype=inverse_dtype,
                         absolute=True, vmem_limit=vmem_limit)       # [M, N]


# --------------------------------------------------------------------------- #
# Public wrapper.
# --------------------------------------------------------------------------- #
def kernel_estimate_block(lr_image, hr_image, *, inverse_mxu_dtype=jnp.float32,
                          force_tiled=False):
    """KernelEstimateBlock.forward: lr_image, hr_image are real [M, N] arrays."""
    assert lr_image.shape == hr_image.shape and lr_image.ndim == 2
    M, N = lr_image.shape
    Nh = N // 2 + 1
    lr = lr_image.astype(jnp.float32)
    hr = hr_image.astype(jnp.float32)

    frm, fim = _dft_matrices(M)            # [M, M]  row-transform DFT
    frh, fih = _rdft_half_matrices(N)      # [N, Nh] rFFT column half-transform
    icr, ici = _irfft_matrices(N)          # [Nh, N] real irfft column transform

    budget = _vmem_budget_bytes()
    if force_tiled or _fused_vmem_estimate(M, N, Nh) > budget:
        return _kernel_estimate_tiled(lr, hr, frm, fim, frh, fih, icr, ici,
                                      inverse_mxu_dtype, budget)

    xs = jnp.concatenate([lr, hr], axis=0)                  # [2M, N]; XLA-side

    flops = int(12 * M * N * Nh + 20 * M * M * Nh)
    bytes_accessed = int(4 * (3 * M * N + 2 * M * M + 4 * N * Nh))
    vmem = pl.BlockSpec(memory_space=pltpu.MemorySpace.VMEM)
    return pl.pallas_call(
        _make_fused_kernel(M, N, Nh, inverse_mxu_dtype),
        out_shape=jax.ShapeDtypeStruct((M, N), jnp.float32),
        in_specs=[vmem] * 7,
        out_specs=vmem,
        compiler_params=pltpu.CompilerParams(vmem_limit_bytes=budget),
        cost_estimate=pl.CostEstimate(flops=flops,
                                      transcendentals=int(M * Nh),
                                      bytes_accessed=bytes_accessed),
    )(xs, frm, fim, frh, fih, icr, ici)


def kernel_estimate_reference(lr_image, hr_image):
    """Pure-JAX reference mirroring the PyTorch module."""
    L = jnp.fft.fft2(lr_image)
    H = jnp.fft.fft2(hr_image)
    nom = jnp.conj(H) * L
    den = jnp.abs(H) ** 2 + EPSILON
    return jnp.abs(jnp.fft.ifft2(nom / den))


if __name__ == "__main__":
    key = jax.random.PRNGKey(0)
    k1, k2, k3, k4 = jax.random.split(key, 4)

    # ---- fused single-call path (small image) ----
    M, N = 16, 16
    lr = jax.random.uniform(k1, (M, N), dtype=jnp.float32)
    hr = jax.random.uniform(k2, (M, N), dtype=jnp.float32)
    out = kernel_estimate_block(lr, hr)
    jax.block_until_ready(out)
    ref = kernel_estimate_reference(lr, hr)
    assert out.shape == (M, N)
    err = float(jnp.max(jnp.abs(out - ref)))
    scale = float(jnp.max(jnp.abs(ref)))
    assert err <= 5e-3 * scale + 1e-5, f"fused: max abs err {err} (scale {scale})"

    # ---- tiled / large-image path (forced at a small non-square shape) ----
    M2, N2 = 32, 48
    lr2 = jax.random.uniform(k3, (M2, N2), dtype=jnp.float32)
    hr2 = jax.random.uniform(k4, (M2, N2), dtype=jnp.float32)
    out2 = kernel_estimate_block(lr2, hr2, force_tiled=True)
    jax.block_until_ready(out2)
    ref2 = kernel_estimate_reference(lr2, hr2)
    assert out2.shape == (M2, N2)
    err2 = float(jnp.max(jnp.abs(out2 - ref2)))
    scale2 = float(jnp.max(jnp.abs(ref2)))
    assert err2 <= 5e-3 * scale2 + 1e-5, f"tiled: max abs err {err2} (scale {scale2})"

    print("KERNEL_OK")
</pallas_src>

<mosaic_0001>
module attributes {stable_mosaic.version = 11 : i64} {
  func.func @kernel(%arg0: memref<32x16xf32, #tpu.memory_space<vmem>>, %arg1: memref<16x16xf32, #tpu.memory_space<vmem>>, %arg2: memref<16x16xf32, #tpu.memory_space<vmem>>, %arg3: memref<16x9xf32, #tpu.memory_space<vmem>>, %arg4: memref<16x9xf32, #tpu.memory_space<vmem>>, %arg5: memref<9x16xf32, #tpu.memory_space<vmem>>, %arg6: memref<9x16xf32, #tpu.memory_space<vmem>>, %arg7: memref<16x16xf32, #tpu.memory_space<vmem>>) attributes {dimension_semantics = [], scalar_prefetch = 0 : i64, scratch_operands = 0 : i64, tpu.core_type = #tpu.core_type<tc>} {
    %c0 = arith.constant 0 : index
    %c0_0 = arith.constant 0 : index
    %0 = vector.load %arg1[%c0, %c0_0] : memref<16x16xf32, #tpu.memory_space<vmem>>, vector<16x16xf32>
    %c0_1 = arith.constant 0 : index
    %c0_2 = arith.constant 0 : index
    %1 = vector.load %arg2[%c0_1, %c0_2] : memref<16x16xf32, #tpu.memory_space<vmem>>, vector<16x16xf32>
    %c0_3 = arith.constant 0 : index
    %c0_4 = arith.constant 0 : index
    %2 = vector.load %arg0[%c0_3, %c0_4] : memref<32x16xf32, #tpu.memory_space<vmem>>, vector<32x16xf32>
    %c0_5 = arith.constant 0 : index
    %c0_6 = arith.constant 0 : index
    %3 = vector.load %arg3[%c0_5, %c0_6] : memref<16x9xf32, #tpu.memory_space<vmem>>, vector<16x9xf32>
    %cst = arith.constant dense<0.000000e+00> : vector<32x9xf32>
    %4 = tpu.matmul %2, %3, %cst {dimension_numbers = #tpu.dot_dimension_numbers<[1], [0], [0], [1], [0, 0, 1, 1], [], []>} : vector<32x16xf32>, vector<16x9xf32>, vector<32x9xf32> -> vector<32x9xf32>
    %c0_7 = arith.constant 0 : index
    %c0_8 = arith.constant 0 : index
    %5 = vector.load %arg4[%c0_7, %c0_8] : memref<16x9xf32, #tpu.memory_space<vmem>>, vector<16x9xf32>
    %cst_9 = arith.constant dense<0.000000e+00> : vector<32x9xf32>
    %6 = tpu.matmul %2, %5, %cst_9 {dimension_numbers = #tpu.dot_dimension_numbers<[1], [0], [0], [1], [0, 0, 1, 1], [], []>} : vector<32x16xf32>, vector<16x9xf32>, vector<32x9xf32> -> vector<32x9xf32>
    %7 = arith.addf %0, %1 : vector<16x16xf32>
    %8 = vector.extract_strided_slice %4 {offsets = [0, 0], sizes = [16, 9], strides = [1, 1]} : vector<32x9xf32> to vector<16x9xf32>
    %9 = vector.extract_strided_slice %6 {offsets = [0, 0], sizes = [16, 9], strides = [1, 1]} : vector<32x9xf32> to vector<16x9xf32>
    %cst_10 = arith.constant dense<0.000000e+00> : vector<16x9xf32>
    %10 = tpu.matmul %0, %8, %cst_10 {dimension_numbers = #tpu.dot_dimension_numbers<[1], [0], [0], [1], [0, 0, 1, 1], [], []>} : vector<16x16xf32>, vector<16x9xf32>, vector<16x9xf32> -> vector<16x9xf32>
    %cst_11 = arith.constant dense<0.000000e+00> : vector<16x9xf32>
    %11 = tpu.matmul %1, %9, %cst_11 {dimension_numbers = #tpu.dot_dimension_numbers<[1], [0], [0], [1], [0, 0, 1, 1], [], []>} : vector<16x16xf32>, vector<16x9xf32>, vector<16x9xf32> -> vector<16x9xf32>
    %12 = arith.addf %8, %9 : vector<16x9xf32>
    %cst_12 = arith.constant dense<0.000000e+00> : vector<16x9xf32>
    %13 = tpu.matmul %7, %12, %cst_12 {dimension_numbers = #tpu.dot_dimension_numbers<[1], [0], [0], [1], [0, 0, 1, 1], [], []>} : vector<16x16xf32>, vector<16x9xf32>, vector<16x9xf32> -> vector<16x9xf32>
    %14 = arith.subf %10, %11 : vector<16x9xf32>
    %15 = arith.subf %13, %10 : vector<16x9xf32>
    %16 = arith.subf %15, %11 : vector<16x9xf32>
    %17 = vector.extract_strided_slice %4 {offsets = [16, 0], sizes = [16, 9], strides = [1, 1]} : vector<32x9xf32> to vector<16x9xf32>
    %18 = vector.extract_strided_slice %6 {offsets = [16, 0], sizes = [16, 9], strides = [1, 1]} : vector<32x9xf32> to vector<16x9xf32>
    %cst_13 = arith.constant dense<0.000000e+00> : vector<16x9xf32>
    %19 = tpu.matmul %0, %17, %cst_13 {dimension_numbers = #tpu.dot_dimension_numbers<[1], [0], [0], [1], [0, 0, 1, 1], [], []>} : vector<16x16xf32>, vector<16x9xf32>, vector<16x9xf32> -> vector<16x9xf32>
    %cst_14 = arith.constant dense<0.000000e+00> : vector<16x9xf32>
    %20 = tpu.matmul %1, %18, %cst_14 {dimension_numbers = #tpu.dot_dimension_numbers<[1], [0], [0], [1], [0, 0, 1, 1], [], []>} : vector<16x16xf32>, vector<16x9xf32>, vector<16x9xf32> -> vector<16x9xf32>
    %21 = arith.addf %17, %18 : vector<16x9xf32>
    %cst_15 = arith.constant dense<0.000000e+00> : vector<16x9xf32>
    %22 = tpu.matmul %7, %21, %cst_15 {dimension_numbers = #tpu.dot_dimension_numbers<[1], [0], [0], [1], [0, 0, 1, 1], [], []>} : vector<16x16xf32>, vector<16x9xf32>, vector<16x9xf32> -> vector<16x9xf32>
    %23 = arith.subf %19, %20 : vector<16x9xf32>
    %24 = arith.subf %22, %19 : vector<16x9xf32>
    %25 = arith.subf %24, %20 : vector<16x9xf32>
    %26 = arith.mulf %23, %23 : vector<16x9xf32>
    %27 = arith.mulf %25, %25 : vector<16x9xf32>
    %28 = arith.addf %26, %27 : vector<16x9xf32>
    %cst_16 = arith.constant 1.000000e-03 : f32
    %29 = vector.broadcast %cst_16 : f32 to vector<16x9xf32>
    %30 = arith.addf %28, %29 : vector<16x9xf32>
    %31 = tpu.reciprocal %30 {approx = true} : vector<16x9xf32> -> vector<16x9xf32>
    %32 = arith.mulf %30, %31 : vector<16x9xf32>
    %cst_17 = arith.constant 2.000000e+00 : f32
    %33 = vector.broadcast %cst_17 : f32 to vector<16x9xf32>
    %34 = arith.subf %33, %32 : vector<16x9xf32>
    %35 = arith.mulf %31, %34 : vector<16x9xf32>
    %cst_18 = arith.constant 3.906250e-03 : f32
    %36 = vector.broadcast %cst_18 : f32 to vector<16x9xf32>
    %37 = arith.mulf %35, %36 : vector<16x9xf32>
    %38 = arith.mulf %23, %14 : vector<16x9xf32>
    %39 = arith.mulf %25, %16 : vector<16x9xf32>
    %40 = arith.addf %38, %39 : vector<16x9xf32>
    %41 = arith.mulf %40, %37 : vector<16x9xf32>
    %42 = arith.mulf %23, %16 : vector<16x9xf32>
    %43 = arith.mulf %25, %14 : vector<16x9xf32>
    %44 = arith.subf %42, %43 : vector<16x9xf32>
    %45 = arith.mulf %44, %37 : vector<16x9xf32>
    %cst_19 = arith.constant dense<0.000000e+00> : vector<16x9xf32>
    %46 = tpu.matmul %0, %41, %cst_19 {dimension_numbers = #tpu.dot_dimension_numbers<[1], [0], [0], [1], [0, 0, 1, 1], [], []>} : vector<16x16xf32>, vector<16x9xf32>, vector<16x9xf32> -> vector<16x9xf32>
    %cst_20 = arith.constant dense<0.000000e+00> : vector<16x9xf32>
    %47 = tpu.matmul %1, %45, %cst_20 {dimension_numbers = #tpu.dot_dimension_numbers<[1], [0], [0], [1], [0, 0, 1, 1], [], []>} : vector<16x16xf32>, vector<16x9xf32>, vector<16x9xf32> -> vector<16x9xf32>
    %48 = arith.subf %0, %1 : vector<16x16xf32>
    %49 = arith.addf %41, %45 : vector<16x9xf32>
    %cst_21 = arith.constant dense<0.000000e+00> : vector<16x9xf32>
    %50 = tpu.matmul %48, %49, %cst_21 {dimension_numbers = #tpu.dot_dimension_numbers<[1], [0], [0], [1], [0, 0, 1, 1], [], []>} : vector<16x16xf32>, vector<16x9xf32>, vector<16x9xf32> -> vector<16x9xf32>
    %51 = arith.addf %46, %47 : vector<16x9xf32>
    %52 = arith.subf %50, %46 : vector<16x9xf32>
    %53 = arith.addf %52, %47 : vector<16x9xf32>
    %c0_22 = arith.constant 0 : index
    %c0_23 = arith.constant 0 : index
    %54 = vector.load %arg5[%c0_22, %c0_23] : memref<9x16xf32, #tpu.memory_space<vmem>>, vector<9x16xf32>
    %cst_24 = arith.constant dense<0.000000e+00> : vector<16x16xf32>
    %55 = tpu.matmul %51, %54, %cst_24 {dimension_numbers = #tpu.dot_dimension_numbers<[1], [0], [0], [1], [0, 0, 1, 1], [], []>} : vector<16x9xf32>, vector<9x16xf32>, vector<16x16xf32> -> vector<16x16xf32>
    %c0_25 = arith.constant 0 : index
    %c0_26 = arith.constant 0 : index
    %56 = vector.load %arg6[%c0_25, %c0_26] : memref<9x16xf32, #tpu.memory_space<vmem>>, vector<9x16xf32>
    %cst_27 = arith.constant dense<0.000000e+00> : vector<16x16xf32>
    %57 = tpu.matmul %53, %56, %cst_27 {dimension_numbers = #tpu.dot_dimension_numbers<[1], [0], [0], [1], [0, 0, 1, 1], [], []>} : vector<16x9xf32>, vector<9x16xf32>, vector<16x16xf32> -> vector<16x16xf32>
    %58 = arith.addf %55, %57 : vector<16x16xf32>
    %59 = math.absf %58 : vector<16x16xf32>
    %c0_28 = arith.constant 0 : index
    %c0_29 = arith.constant 0 : index
    %60 = vector.load %arg7[%c0_28, %c0_29] : memref<16x16xf32, #tpu.memory_space<vmem>>, vector<16x16xf32>
    tpu.vector_store %arg7[%c0_28, %c0_29], %59 {strides = array<i32>} : memref<16x16xf32, #tpu.memory_space<vmem>>, vector<16x16xf32>,
    return
  }
}

</mosaic_0001>

<bundles_post_ra>
// kernel: tpu_custom_call.1
= control target key start
LH: loop header
LB: loop body
LE: loop exit
PB: predicated region body
PF: predicated region fallthrough
CT: control target
= control target key end

     0   :  { %12 = vsyncpa [#allocation3], 0  ;;  %s848_s0 = inlined_call_operand.vmem [shape: f32[32,16], index: 0, kind: input, shape index: {}]   ;;  %s849_s1 = inlined_call_operand.vmem [shape: f32[16,16], index: 1, kind: input, shape index: {}]   ;;  %s850_s2 = inlined_call_operand.vmem [shape: f32[16,16], index: 2, kind: input, shape index: {}]   ;;  %s851_s3 = inlined_call_operand.vmem [shape: f32[16,9], index: 3, kind: input, shape index: {}]   ;;  %s852_s4 = inlined_call_operand.hbm [shape: f32[16,9], index: 4, kind: input, shape index: {}]   ;;  %s853_s5 = inlined_call_operand.hbm [shape: f32[9,16], index: 5, kind: input, shape index: {}]   ;;  %s854_s6 = inlined_call_operand.hbm [shape: f32[9,16], index: 6, kind: input, shape index: {}]   ;;  %s855_s7 = inlined_call_operand.hbm [shape: f32[16,16], index: 7, kind: output, shape index: {}]  }
   0x1   :  { %13 = vsyncpa [#allocation6], 0 }
   0x2   :  { %14 = vsyncpa [#allocation4], 0  ;;  %s40_s26 = sshll.u32 %s853_s5, 4  ;;  %s690_s27 = smov [#allocation5]   ;;  %s41_s26 = int_to_ptr.hbm [resolvable:$true] %s40_s26 }
   0x3   :  { %s42_s28 = sshll.u32 %s690_s27, 4  ;;  %s27_s8 = sshll.u32 %s852_s4, 4  ;;  %s43_s28 = int_to_ptr.vmem [resolvable:$true] %s42_s28  ;;  %s28_s8 = int_to_ptr.hbm [resolvable:$true] %s27_s8 }
   0x4   :  { %s691_s9 = smov 128   ;;  %s692_s10 = smov 8  }
   0x5   :  { %48 = dma.hbm_to_vmem [thread:$0]  %s41_s26, 256, %s43_s28, [#allocation6], %s691_s9, %s691_s9, %s692_s10  }
   0x6   :  { %s693_s11 = smov [#allocation2]   ;;  %s53_s5 = sshll.u32 %s854_s6, 4  ;;  %s54_s5 = int_to_ptr.hbm [resolvable:$true] %s53_s5 }
   0x7   :  { %s29_s12 = sshll.u32 %s693_s11, 4  ;;  %s694_s4 = smov [#allocation7]   ;;  %s30_s12 = int_to_ptr.vmem [resolvable:$true] %s29_s12 }
   0x8   :  { %35 = dma.hbm_to_vmem [thread:$0]  %s28_s8, 256, %s30_s12, [#allocation3], %s691_s9, %s691_s9, %s692_s10  }
   0x9   :  { %s55_s15 = sshll.u32 %s694_s4, 4  ;;  %s56_s15 = int_to_ptr.vmem [resolvable:$true] %s55_s15 }
   0xa   :  { %61 = dma.hbm_to_vmem [thread:$0]  %s54_s5, 256, %s56_s15, [#allocation6], %s691_s9, %s691_s9, %s692_s10  }
   0xb   :  { %684 = dma.done.wait [#allocation3], 256  }
   0xc   :  { %685 = vsyncadd [#allocation3], 4294967040 }
   0xd   :  { %686 = dma.done.wait [#allocation6], 512  }
   0xe   :  { %687 = vsyncadd [#allocation6], 4294966784  ;;  %v83_v0 = vld [vmem:[%s851_s3 + $0x8] sm:$0xff]  ;;  %v82_v2 = vld [vmem:[%s851_s3] sm:$0xff]  ;;  %vm84_vm0 = vcmask 130048   ;;  %vm461_vm1 = vcmask 1040384  }
   0xf   :  { %v127_v1 = vld [vmem:[#allocation2 + $0x8] sm:$0xff]  ;;  %111 = vmatpush.msra.mxu0 %v83_v0  ;;  %v126_v3 = vld [vmem:[#allocation2] sm:$0xff]  ;;  %v80_v6 = vld [vmem:[%s848_s0 + $0x10] sm:$0xff]  ;;  %vm454_vm2 = vcmask 72704   ;;  %s530_s14 = sshll.u32 %s855_s7, 4  ;;  %s531_s14 = int_to_ptr.hbm [resolvable:$true] %s530_s14 }
  0x10   :  { %142 = vmatpush.msra.mxu1 %v127_v1  ;;  %v78_v4 = vld [vmem:[%s848_s0] sm:$0xff]  ;;  %v79_v5 = vld [vmem:[%s848_s0 + $0x8] sm:$0xff]  ;;  %v81_v7 = vld [vmem:[%s848_s0 + $0x18] sm:$0xff] }
  0x11   :  { %112 = vmatpush.msra.mxu0 %v82_v2  ;;  %v783_v12 = vld [vmem:[%s849_s1] sm:$0xff]  ;;  %v797_v18 = vld [vmem:[%s849_s1 + $0x8] sm:$0xff]  ;;  %s695_s1 = smov [#allocation8]  }
  0x12   :  { %143 = vmatpush.msra.mxu1 %v126_v3  ;;  %544 = vmatmul.msk.f32.vlgmr.msra.gmra.mxu0 %vm84_vm0, %v78_v4  ;;  %v788_v13 = vld [vmem:[%s850_s2] sm:$0xff]  ;;  %v802_v19 = vld [vmem:[%s850_s2 + $0x8] sm:$0xff]  ;;  %s528_s2 = sshll.u32 %s695_s1, 4  ;;  %s529_s2 = int_to_ptr.vmem [resolvable:$true] %s528_s2 }
  0x13   :  { %548 = vmatmul.msk.f32.vlgmr.msra.gmra.mxu1 %vm84_vm0, %v78_v4  ;;  %v157_v22 = vadd.f32 %v788_v13, %v783_v12  ;;  %v158_v25 = vadd.f32 %v802_v19, %v797_v18  ;;  %v453_v52 = vld [vmem:[#allocation7 + $0x8] sm:$0x1] }
  0x1a   :  { %545 = vmatmul.msk.f32.gmra.mxu0 %vm84_vm0, %v79_v5 }
  0x1b   :  { %549 = vmatmul.msk.f32.gmra.mxu1 %vm84_vm0, %v79_v5 }
  0x22   :  { %546 = vmatmul.msk.f32.gmra.mxu0 %vm84_vm0, %v80_v6 }
  0x23   :  { %550 = vmatmul.msk.f32.gmra.mxu1 %vm84_vm0, %v80_v6 }
  0x2a   :  { %547 = vmatmul.msk.f32.gmra.mxu0 %vm84_vm0, %v81_v7 }
  0x2b   :  { %551 = vmatmul.msk.f32.gmra.mxu1 %vm84_vm0, %v81_v7 }
  0x8f   :  { %v114_v8 = vpop.f32.mrf.mxu0 }
  0x90   :  { %v145_v9 = vpop.f32.mrf.mxu1 }
  0x91   :  { %v217_v15 = vadd.f32 %v145_v9, %v114_v8 }
  0x97   :  { %v117_v10 = vpop.f32.mrf.mxu0 }
  0x98   :  { %v148_v11 = vpop.f32.mrf.mxu1  ;;  %179 = vmatpush.msra.mxu2 %v117_v10 }
  0x99   :  { %208 = vmatpush.msra.mxu3 %v148_v11  ;;  %v218_v14 = vadd.f32 %v148_v11, %v117_v10 }
  0x9a   :  { %180 = vmatpush.msra.mxu2 %v114_v8 }
  0x9b   :  { %209 = vmatpush.msra.mxu3 %v145_v9  ;;  %552 = vmatmul.msk.f32.vlgmr.msra.gmra.mxu2 %vm84_vm0, %v783_v12 }
  0x9c   :  { %554 = vmatmul.msk.f32.vlgmr.msra.gmra.mxu3 %vm84_vm0, %v788_v13  ;;  %239 = vmatpush.msrb.mxu2 %v218_v14 }
  0x9e   :  { %240 = vmatpush.msrb.mxu2 %v217_v15 }
  0x9f   :  { %v120_v16 = vpop.f32.mrf.mxu0 }
  0xa0   :  { %v151_v17 = vpop.f32.mrf.mxu1 }
  0xa1   :  { %v300_v24 = vadd.f32 %v151_v17, %v120_v16 }
  0xa3   :  { %553 = vmatmul.msk.f32.gmra.mxu2 %vm84_vm0, %v797_v18 }
  0xa4   :  { %555 = vmatmul.msk.f32.gmra.mxu3 %vm84_vm0, %v802_v19 }
  0xa7   :  { %v123_v20 = vpop.f32.mrf.mxu0 }
  0xa8   :  { %v154_v21 = vpop.f32.mrf.mxu1  ;;  %268 = vmatpush.msrb.mxu3 %v123_v20 }
  0xa9   :  { %291 = vmatpush.msrb.mxu0 %v154_v21  ;;  %v301_v23 = vadd.f32 %v154_v21, %v123_v20 }
  0xaa   :  { %269 = vmatpush.msrb.mxu3 %v120_v16 }
  0xab   :  { %292 = vmatpush.msrb.mxu0 %v151_v17  ;;  %316 = vmatpush.msrb.mxu1 %v301_v23 }
  0xac   :  { %556 = vmatmul.msk.f32.vlgmr.msrb.gmra.mxu2 %vm84_vm0, %v157_v22  ;;  %558 = vmatmul.msk.f32.vlgmr.msrb.gmra.mxu3 %vm84_vm0, %v783_v12 }
  0xad   :  { %560 = vmatmul.msk.f32.vlgmr.msrb.gmra.mxu0 %vm84_vm0, %v788_v13  ;;  %576 = vmatpush.msra.mxu3 %v154_v21 }
  0xae   :  { %317 = vmatpush.msrb.mxu1 %v300_v24 }
  0xaf   :  { %562 = vmatmul.msk.f32.vlgmr.msrb.gmra.mxu1 %vm84_vm0, %v157_v22  ;;  %577 = vmatpush.msra.mxu3 %v151_v17 }
  0xb0   :  { %570 = vmatpush.msk.msra.mxu1 %vm461_vm1, %v453_v52 }
  0xb4   :  { %557 = vmatmul.msk.f32.gmra.mxu2 %vm84_vm0, %v158_v25  ;;  %559 = vmatmul.msk.f32.gmra.mxu3 %vm84_vm0, %v797_v18 }
  0xb7   :  { %563 = vmatmul.msk.f32.gmra.mxu1 %vm84_vm0, %v158_v25 }
  0xbc   :  { %561 = vmatmul.msk.f32.vlgmr.msra.gmra.mxu3 %vm84_vm0, %v802_v19 }
 0x11e   :  { %v182_v28 = vpop.f32.mrf.mxu2 }
 0x11f   :  { %v211_v26 = vpop.f32.mrf.mxu3 }
 0x120   :  { %v248_v63 = vsub.f32 %v182_v28, %v211_v26 }
 0x126   :  { %v185_v35 = vpop.f32.mrf.mxu2 }
 0x127   :  { %v214_v27 = vpop.f32.mrf.mxu3 }
 0x128   :  { %v249_v59 = vsub.f32 %v185_v35, %v214_v27 }
 0x12a   :  { %v294_v30 = vpop.f32.mrf.mxu0 }
 0x12c   :  { %v319_v29 = vpop.f32.mrf.mxu1 }
 0x12f   :  { %v271_v31 = vpop.f32.mrf.mxu3  ;;  %v242_v42 = vpop.f32.mrf.mxu2 }
 0x130   :  { %v327_v32 = vsub.f32 %v319_v29, %v271_v31  ;;  %v325_v33 = vsub.f32 %v271_v31, %v294_v30  ;;  %v250_v55 = vsub.f32 %v242_v42, %v182_v28  ;;  %v412_v29 = vsub.f32 %v797_v18, %v802_v19 }
 0x132   :  { %v329_v34 = vsub.f32 %v327_v32, %v294_v30  ;;  %v331_v37 = vmul.f32 %v325_v33, %v325_v33  ;;  %v252_v60 = vsub.f32 %v250_v55, %v211_v26  ;;  %v349_v10 = vmul.f32 %v325_v33, %v248_v63  ;;  %v451_v26 = vld [vmem:[#allocation5 + $0x8] sm:$0x1]  ;;  %v452_v30 = vld [vmem:[#allocation7] sm:$0xff] }
 0x133   :  { %480 = vmatpush.msra.mxu1 %v452_v30 }
 0x134   :  { %v333_v36 = vmul.f32 %v329_v34, %v329_v34  ;;  %v322_v41 = vpop.f32.mrf.mxu1  ;;  %v357_v6 = vmul.f32 %v325_v33, %v252_v60  ;;  %v351_v7 = vmul.f32 %v329_v34, %v252_v60  ;;  %v359_v8 = vmul.f32 %v329_v34, %v248_v63 }
 0x136   :  { %v335_v38 = vadd.f32 %v333_v36, %v331_v37  ;;  %v353_v17 = vadd.f32 %v351_v7, %v349_v10  ;;  %v361_v20 = vsub.f32 %v357_v6, %v359_v8 }
 0x137   :  { %v274_v39 = vpop.f32.mrf.mxu3  ;;  %v245_v53 = vpop.f32.mrf.mxu2 }
 0x138   :  { %v337_v40 = vadd.f32 0.001, %v335_v38  ;;  %v328_v43 = vsub.f32 %v322_v41, %v274_v39  ;;  %v251_v56 = vsub.f32 %v245_v53, %v185_v35 }
 0x13a   :  { %584 = vrcp.f32 %v337_v40  ;;  %v253_v61 = vsub.f32 %v251_v56, %v214_v27  ;;  %v411_v27 = vsub.f32 %v783_v12, %v788_v13 }
 0x13f   :  { %v297_v44 = vpop.f32.mrf.mxu3 }
 0x140   :  { %v326_v45 = vsub.f32 %v274_v39, %v297_v44  ;;  %v330_v46 = vsub.f32 %v328_v43, %v297_v44  ;;  %v585_v50 = vpop.eup %584 }
 0x141   :  { %v341_v54 = vmul.f32 %v585_v50, %v337_v40 }
 0x142   :  { %v332_v47 = vmul.f32 %v326_v45, %v326_v45  ;;  %v334_v48 = vmul.f32 %v330_v46, %v330_v46  ;;  %v350_v0 = vmul.f32 %v326_v45, %v249_v59  ;;  %v352_v3 = vmul.f32 %v330_v46, %v253_v61 }
 0x143   :  { %v343_v57 = vsub.f32 2.0, %v341_v54  ;;  %v358_v4 = vmul.f32 %v326_v45, %v253_v61  ;;  %v360_v5 = vmul.f32 %v330_v46, %v249_v59 }
 0x144   :  { %v336_v49 = vadd.f32 %v334_v48, %v332_v47  ;;  %v354_v14 = vadd.f32 %v352_v3, %v350_v0 }
 0x145   :  { %v345_v1 = vmul.f32 %v585_v50, %v343_v57  ;;  %v362_v15 = vsub.f32 %v358_v4, %v360_v5 }
 0x146   :  { %v338_v51 = vadd.f32 0.001, %v336_v49 }
 0x147   :  { %v347_v11 = vmul.f32 0.00390625, %v345_v1 }
 0x148   :  { %586 = vrcp.f32 %v338_v51 }
 0x149   :  { %v355_v23 = vmul.f32 %v353_v17, %v347_v11  ;;  %v363_v24 = vmul.f32 %v361_v20, %v347_v11 }
 0x14b   :  { %v413_v28 = vadd.f32 %v363_v24, %v355_v23 }
 0x14e   :  { %v587_v58 = vpop.eup %586 }
 0x14f   :  { %v342_v62 = vmul.f32 %v587_v58, %v338_v51 }
 0x151   :  { %v344_v2 = vsub.f32 2.0, %v342_v62 }
 0x153   :  { %v346_v9 = vmul.f32 %v587_v58, %v344_v2 }
 0x155   :  { %v348_v16 = vmul.f32 0.00390625, %v346_v9 }
 0x157   :  { %v356_v21 = vmul.f32 %v354_v14, %v348_v16  ;;  %v364_v22 = vmul.f32 %v362_v15, %v348_v16 }
 0x159   :  { %379 = vmatpush.msra.mxu2 %v356_v21  ;;  %402 = vmatpush.msrb.mxu3 %v364_v22  ;;  %v414_v25 = vadd.f32 %v364_v22, %v356_v21 }
 0x15b   :  { %380 = vmatpush.msra.mxu2 %v355_v23  ;;  %403 = vmatpush.msrb.mxu3 %v363_v24 }
 0x15c   :  { %435 = vmatpush.msra.mxu0 %v414_v25  ;;  %564 = vmatmul.msk.f32.vlgmr.msra.gmra.mxu2 %vm84_vm0, %v783_v12  ;;  %v450_v12 = vld [vmem:[#allocation5] sm:$0xff] }
 0x15d   :  { %566 = vmatmul.msk.f32.vlgmr.msrb.gmra.mxu3 %vm84_vm0, %v788_v13  ;;  %573 = vmatpush.msk.msrb.mxu2 %vm461_vm1, %v451_v26 }
 0x15e   :  { %436 = vmatpush.msra.mxu0 %v413_v28 }
 0x15f   :  { %568 = vmatmul.msk.f32.vlgmr.msra.gmra.mxu0 %vm84_vm0, %v411_v27  ;;  %512 = vmatpush.msrb.mxu2 %v450_v12 }
 0x164   :  { %565 = vmatmul.msk.f32.gmra.mxu2 %vm84_vm0, %v797_v18 }
 0x165   :  { %567 = vmatmul.msk.f32.gmra.mxu3 %vm84_vm0, %v802_v19 }
 0x167   :  { %569 = vmatmul.msk.f32.gmra.mxu0 %vm84_vm0, %v412_v29 }
 0x1dc   :  { %v438_v13 = vpop.f32.mrf.mxu0 }
 0x1df   :  { %v382_v31 = vpop.f32.mrf.mxu2 }
 0x1e0   :  { %v405_v32 = vpop.f32.mrf.mxu3  ;;  %v446_v33 = vsub.f32 %v438_v13, %v382_v31 }
 0x1e1   :  { %v444_v34 = vadd.f32 %v405_v32, %v382_v31 }
 0x1e2   :  { %v448_v35 = vadd.f32 %v446_v33, %v405_v32 }
 0x1e3   :  { %574 = vmatmul.msk.f32.vlgmr.msrb.gmra.mxu2 %vm454_vm2, %v444_v34 }
 0x1e4   :  { %571 = vmatmul.msk.f32.vlgmr.msra.gmra.mxu1 %vm454_vm2, %v448_v35  ;;  %v441_v36 = vpop.f32.mrf.mxu0 }
 0x1e7   :  { %v385_v18 = vpop.f32.mrf.mxu2 }
 0x1e8   :  { %v408_v37 = vpop.f32.mrf.mxu3  ;;  %v447_v38 = vsub.f32 %v441_v36, %v385_v18 }
 0x1e9   :  { %v445_v19 = vadd.f32 %v408_v37, %v385_v18 }
 0x1ea   :  { %v449_v39 = vadd.f32 %v447_v38, %v408_v37 }
 0x1eb   :  { %575 = vmatmul.msk.f32.gmra.mxu2 %vm454_vm2, %v445_v19 }
 0x1ec   :  { %572 = vmatmul.msk.f32.gmra.mxu1 %vm454_vm2, %v449_v39 }
 0x261   :  { %v482_v40 = vpop.f32.mrf.mxu1 }
 0x266   :  { %v514_v41 = vpop.f32.mrf.mxu2 }
 0x267   :  { %v515_v42 = vadd.f32 %v514_v41, %v482_v40 }
 0x269   :  { %v520_v43 = vand.u32 2147483647, %v515_v42  ;;  %v485_v44 = vpop.f32.mrf.mxu1 }
 0x26b   :  { %522 = vst.msk [vmem:[#allocation8] sm:$0xff] %vm84_vm0, %v520_v43 }
 0x26e   :  { %v517_v45 = vpop.f32.mrf.mxu2 }
 0x26f   :  { %v518_v46 = vadd.f32 %v517_v45, %v485_v44 }
 0x271   :  { %v521_v47 = vand.u32 2147483647, %v518_v46 }
 0x273   :  { %523 = vst.msk [vmem:[#allocation8 + $0x8] sm:$0xff] %vm84_vm0, %v521_v47 }
 0x274   :  { %536 = dma.vmem_to_hbm [thread:$0]  %s529_s2, 256, %s531_s14, [#allocation4], %s691_s9, %s691_s9, %s692_s10  }
 0x275   :  { %688 = dma.done.wait [#allocation4], 256  }
 0x276   :  { %689 = vsyncadd [#allocation4], 4294967040 }
 0x277   :  { %541 = vsyncpa [#allocation3], 1 }
 0x278   :  { %542 = vsyncpa [#allocation6], 1 }
 0x279   :  { %543 = vsyncpa [#allocation4], 1 }

</bundles_post_ra>
